<compile_context>
chip_gen: v5e
topology: v5e:2x2
jax: 0.10.0
libtpu: 0.0.40
codegen_flags: <defaults>
</compile_context>

<pallas_src>
import functools

import jax
import jax.numpy as jnp
from jax.experimental import pallas as pl
from jax.experimental.pallas import tpu as pltpu


# ---------------------------------------------------------------------------
# Kernel 1: value-out projection + bf16 cast of x (the "K" after folding)
# ---------------------------------------------------------------------------
def proj_kernel(x_ref, wvo_ref, xb_ref, vo_ref):
    # x_ref: (TR, D) f32 row tile; wvo_ref: (D, D) bf16 resident (Wv^T @ Wo^T).
    xb = x_ref[...].astype(jnp.bfloat16)
    xb_ref[...] = xb                                   # K == x for heads=1 (Wk folded into Wq)
    vo_ref[...] = jnp.dot(xb, wvo_ref[...],
                          preferred_element_type=jnp.float32).astype(jnp.bfloat16)


# ---------------------------------------------------------------------------
# Kernel 2: q-proj + attention rows + regressor head (per query tile)
# ---------------------------------------------------------------------------
def head_kernel(
    x_ref,            # (TQ, D) f32   streamed frame-feature tile (residual + Q source)
    xb_ref,           # (T,  D) bf16  resident: x in bf16 (plays the role of K)
    vo_ref,           # (T,  D) bf16  resident: x @ (Wv^T Wo^T)
    wqk_ref,          # (D,  D) bf16  resident: Wq^T @ Wk
    g1_ref, be1_ref,  # (1, D) f32    norm_y gamma / beta
    w1_ref, b1_ref,   # (D, D) bf16, (1, D) f32   linear_1 (pre-transposed) + bias
    g2_ref, be2_ref,  # (1, D) f32    norm_linear gamma / beta
    w2_ref, b2_ref,   # (1, D) f32, (1, 1) f32    linear_2 weight row + bias
    scores_ref,       # (TQ, 1)  f32  output: sigmoid importance scores
    attn_ref,         # (TQ, T)       output: attention weights (pre-dropout)
    *, bf16_exp,
):
    x = x_ref[...]                                     # (TQ, D) f32
    xb_tile = x.astype(jnp.bfloat16)

    # Q' = x @ (Wq^T Wk): the K projection is folded away for heads=1, so
    # energies = Q' @ x^T.
    q = jnp.dot(xb_tile, wqk_ref[...],
                preferred_element_type=jnp.float32).astype(jnp.bfloat16)

    # energies = Q' @ K^T with K == x (bf16, resident); contract the feature dim.
    # TODO(synk): per perf review, verify this lowering does not re-transpose xb each
    # grid step (grep bundles for vxpose); if it does, emit a pre-transposed (D, T)
    # copy from proj_kernel when T % 128 == 0 and use a plain (TQ,D)@(D,T) dot.
    energies = jax.lax.dot_general(
        q, xb_ref[...], (((1,), (1,)), ((), ())),
        preferred_element_type=jnp.float32)            # (TQ, T)

    # Numerically-stable softmax(dim=-1).  exp in bf16 on v6e/v7x (EUP relief),
    # f32 on v5e; max / sum / normalization stay f32.
    m = jnp.max(energies, axis=-1, keepdims=True)
    if bf16_exp:
        e = jnp.exp((energies - m).astype(jnp.bfloat16)).astype(jnp.float32)
    else:
        e = jnp.exp(energies - m)
    s = jnp.sum(e, axis=-1, keepdims=True)
    attn = e * pl.reciprocal(s)                        # exact: rows sum to ~1 (returned output)
    attn_ref[...] = attn.astype(attn_ref.dtype)

    # TODO(synk): nn.Dropout(p=0.5) on attn / activations is identity at inference; omitted.
    # ctx = attn @ (V Wo^T) — Wo folded into the value projection at prep time.
    y = jnp.dot(attn.astype(jnp.bfloat16), vo_ref[...],
                preferred_element_type=jnp.float32)    # (TQ, D)

    # --- PGL_SUM head ---
    y = y + x                                          # residual

    # LayerNorm norm_y (eps=1e-6, biased variance)
    mu = jnp.mean(y, axis=-1, keepdims=True)
    var = jnp.mean((y - mu) ** 2, axis=-1, keepdims=True)
    y = (y - mu) * jax.lax.rsqrt(var + 1e-6) * g1_ref[...] + be1_ref[...]

    # linear_1 + ReLU (bf16 operands, f32 accumulate)
    y = jnp.dot(y.astype(jnp.bfloat16), w1_ref[...],
                preferred_element_type=jnp.float32) + b1_ref[...]
    y = jnp.maximum(y, 0.0)

    # LayerNorm norm_linear
    mu = jnp.mean(y, axis=-1, keepdims=True)
    var = jnp.mean((y - mu) ** 2, axis=-1, keepdims=True)
    y = (y - mu) * jax.lax.rsqrt(var + 1e-6) * g2_ref[...] + be2_ref[...]

    # linear_2 as VPU multiply + lane reduction (avoids an N=1 MXU matmul), + sigmoid.
    logits = jnp.sum(y * w2_ref[...], axis=-1, keepdims=True) + b2_ref[...]  # (TQ, 1)
    scores_ref[...] = jax.nn.sigmoid(logits)


# ---------------------------------------------------------------------------
# One-time parameter preparation (weight folding, transpose, bf16 cast)
# ---------------------------------------------------------------------------
def prepare_params(params):
    D = params["Wq"].shape[1]
    f32 = jnp.float32
    # heads=1 algebraic folding (done once, in f32, at load time):
    #   energies = (x Wq^T)(x Wk^T)^T = x (Wq^T Wk) x^T     -> Wqk
    #   out      = (attn x Wv^T) Wo^T = attn (x (Wv^T Wo^T)) -> Wvo
    wqk = (params["Wq"].T.astype(f32) @ params["Wk"].astype(f32)).astype(jnp.bfloat16)
    wvo = (params["Wv"].T.astype(f32) @ params["Wo"].T.astype(f32)).astype(jnp.bfloat16)
    return {
        "wqk": wqk,                                             # [D, D] bf16
        "wvo": wvo,                                             # [D, D] bf16
        "g1": params["ln1_g"].reshape(1, D).astype(f32),
        "be1": params["ln1_b"].reshape(1, D).astype(f32),
        "w1": params["W1"].T.astype(jnp.bfloat16),              # [D, D] bf16
        "b1": params["b1"].reshape(1, D).astype(f32),
        "g2": params["ln2_g"].reshape(1, D).astype(f32),
        "be2": params["ln2_b"].reshape(1, D).astype(f32),
        "w2": params["W2"].reshape(1, D).astype(f32),           # [1, D] row
        "b2": params["b2"].reshape(1, 1).astype(f32),
    }


# ---------------------------------------------------------------------------
# Tiling / compiler-parameter helpers
# ---------------------------------------------------------------------------
def _pick_tq(T):
    """Largest multiple-of-8 divisor of T <= 128, preferring >= 4 grid steps
    (>= 2 per v7x TensorCore) when that still allows tq >= 32."""
    divisors = [d for d in range(8, min(128, T) + 1, 8) if T % d == 0]
    if not divisors:
        return T        # single tile fallback (T itself is a multiple of 8)
    for d in reversed(divisors):
        if T // d >= 4 and d >= 32:
            return d
    return divisors[-1]


def _default_bf16_exp():
    try:
        kind = jax.devices()[0].device_kind.lower()
    except Exception:
        return False
    # bf16 EUP/VPU path exists on v6e / v7x; keep f32 on v5e and older.
    return not any(v in kind for v in ("v2", "v3", "v4", "v5"))


def _vmem_limit_bytes(T, D, tq, attn_itemsize):
    """Footprint-based VMEM limit; stays well under v7x's 64 MiB for moderate T."""
    resident = 2 * (2 * T * D * 2)                    # xb + vo (bf16), double-buffered
    weights = 2 * (2 * D * D * 2 + 8 * D * 4 + 64)    # wqk/w1 bf16 + small f32 vectors
    streams = 2 * (tq * D * 4)                        # streamed x tile
    outs = 2 * (tq * T * attn_itemsize + tq * 4)      # attn + scores tiles
    work = 3 * tq * T * 4 + 6 * tq * D * 4            # softmax / head intermediates
    est = resident + weights + streams + outs + work
    mib = 1024 * 1024
    return int(max(16 * mib, min(2 * est, 40 * mib), est + 4 * mib))


# ---------------------------------------------------------------------------
# Forward wrapper
# ---------------------------------------------------------------------------
def pgl_sum_forward(x, prep, *, tq=None, attn_dtype=jnp.float32, bf16_exp=None):
    """x: [T, D] f32.  Returns (scores [1, T] f32, attn_weights [T, T] attn_dtype)."""
    T, D = x.shape
    assert D % 128 == 0, "feature dim must be lane-aligned (multiple of 128)"
    assert T % 8 == 0, "frame count must be a multiple of 8"
    if tq is None:
        tq = _pick_tq(T)
    assert T % tq == 0 and (tq % 8 == 0 or tq == T)
    G = T // tq
    if bf16_exp is None:
        bf16_exp = _default_bf16_exp()

    cparams = pltpu.CompilerParams(
        dimension_semantics=("parallel",),
        vmem_limit_bytes=_vmem_limit_bytes(T, D, tq, jnp.dtype(attn_dtype).itemsize),
    )

    # ---- Kernel 1: value-out projection + bf16 cast, gridded over row tiles ----
    xb, vo = pl.pallas_call(
        proj_kernel,
        out_shape=(jax.ShapeDtypeStruct((T, D), jnp.bfloat16),
                   jax.ShapeDtypeStruct((T, D), jnp.bfloat16)),
        grid_spec=pltpu.PrefetchScalarGridSpec(
            num_scalar_prefetch=0,
            grid=(G,),
            in_specs=[
                pl.BlockSpec((tq, D), lambda i: (i, 0)),    # x row tile
                pl.BlockSpec((D, D), lambda i: (0, 0)),     # Wvo (resident)
            ],
            out_specs=(pl.BlockSpec((tq, D), lambda i: (i, 0)),
                       pl.BlockSpec((tq, D), lambda i: (i, 0))),
        ),
        compiler_params=cparams,
    )(x, prep["wvo"])

    # ---- Kernel 2: attention + head, gridded over query tiles ----
    # Resident blocks use constant index maps (fetched once, kept in VMEM).
    # NOTE (v7x): these are double-buffered by default; pipeline_mode=pl.Buffered(1)
    # would halve their VMEM footprint — left out to avoid API-version risk.
    resident = lambda shape: pl.BlockSpec(shape, lambda i: (0, 0))
    # TODO(synk): for very large T (>= ~4-8K) add a KV grid axis with an
    # online-softmax accumulator instead of holding full xb/vo resident.
    scores, attn = pl.pallas_call(
        functools.partial(head_kernel, bf16_exp=bf16_exp),
        out_shape=(
            jax.ShapeDtypeStruct((T, 1), jnp.float32),
            jax.ShapeDtypeStruct((T, T), attn_dtype),
        ),
        grid_spec=pltpu.PrefetchScalarGridSpec(
            num_scalar_prefetch=0,
            grid=(G,),
            in_specs=[
                pl.BlockSpec((tq, D), lambda i: (i, 0)),    # x tile (residual + Q source)
                resident((T, D)),                           # xb  (K, resident)
                resident((T, D)),                           # vo  (V @ Wo^T, resident)
                resident((D, D)),                           # Wqk
                resident((1, D)), resident((1, D)),         # ln1 gamma / beta
                resident((D, D)), resident((1, D)),         # W1, b1
                resident((1, D)), resident((1, D)),         # ln2 gamma / beta
                resident((1, D)), resident((1, 1)),         # w2 row, b2
            ],
            out_specs=(
                pl.BlockSpec((tq, 1), lambda i: (i, 0)),    # scores tile
                pl.BlockSpec((tq, T), lambda i: (i, 0)),    # attn rows tile
            ),
        ),
        compiler_params=cparams,
    )(
        x, xb, vo,
        prep["wqk"], prep["g1"], prep["be1"], prep["w1"], prep["b1"],
        prep["g2"], prep["be2"], prep["w2"], prep["b2"],
    )

    return scores.reshape(1, T), attn


# ---------------------------------------------------------------------------
# Pure-JAX f32 reference matching the PyTorch forward (eval mode)
# ---------------------------------------------------------------------------
def _reference(x, p):
    q = x @ p["Wq"].T
    k = x @ p["Wk"].T
    v = x @ p["Wv"].T
    energies = q @ k.T
    attn = jax.nn.softmax(energies, axis=-1)
    y = (attn @ v) @ p["Wo"].T
    y = y + x

    def ln(z, g, b):
        mu = z.mean(-1, keepdims=True)
        var = ((z - mu) ** 2).mean(-1, keepdims=True)
        return (z - mu) / jnp.sqrt(var + 1e-6) * g + b

    y = ln(y, p["ln1_g"], p["ln1_b"])
    y = jnp.maximum(y @ p["W1"].T + p["b1"], 0.0)
    y = ln(y, p["ln2_g"], p["ln2_b"])
    y = jax.nn.sigmoid(y @ p["W2"].T + p["b2"])
    return y.reshape(1, -1), attn


if __name__ == "__main__":
    # Small but grid-exercising shapes: T=256 frames, D=128 features.
    # _pick_tq(256) = 64 -> 4 grid steps (2 per v7x TensorCore).
    T, D = 256, 128

    key = jax.random.PRNGKey(0)
    ks = jax.random.split(key, 10)
    scale = 0.05
    params = {
        "Wq": scale * jax.random.normal(ks[0], (D, D), jnp.float32),
        "Wk": scale * jax.random.normal(ks[1], (D, D), jnp.float32),
        "Wv": scale * jax.random.normal(ks[2], (D, D), jnp.float32),
        "Wo": scale * jax.random.normal(ks[3], (D, D), jnp.float32),
        "ln1_g": jnp.ones((D,), jnp.float32),
        "ln1_b": jnp.zeros((D,), jnp.float32),
        "W1": scale * jax.random.normal(ks[4], (D, D), jnp.float32),
        "b1": scale * jax.random.normal(ks[5], (D,), jnp.float32),
        "ln2_g": jnp.ones((D,), jnp.float32),
        "ln2_b": jnp.zeros((D,), jnp.float32),
        "W2": scale * jax.random.normal(ks[6], (1, D), jnp.float32),
        "b2": scale * jax.random.normal(ks[7], (1,), jnp.float32),
    }
    x = jax.random.normal(ks[8], (T, D), jnp.float32)

    prep = prepare_params(params)   # one-time weight folding / transpose / bf16 cast
    scores, attn = pgl_sum_forward(x, prep)
    jax.block_until_ready((scores, attn))

    ref_scores, ref_attn = _reference(x, params)
    assert scores.shape == (1, T) and attn.shape == (T, T)
    # bf16 MXU operands (f32 accumulation) + folded weights -> loose tolerance.
    assert jnp.allclose(scores, ref_scores, atol=2e-2, rtol=2e-2)
    assert jnp.allclose(attn.astype(jnp.float32), ref_attn, atol=2e-2, rtol=2e-2)

    print("KERNEL_OK")
</pallas_src>

<mosaic_0001>
module attributes {stable_mosaic.version = 11 : i64} {
  func.func @proj_kernel(%arg0: i32, %arg1: memref<64x128xf32, #tpu.memory_space<vmem>>, %arg2: memref<128x128xbf16, #tpu.memory_space<vmem>>, %arg3: memref<64x128xbf16, #tpu.memory_space<vmem>>, %arg4: memref<64x128xbf16, #tpu.memory_space<vmem>>) attributes {dimension_semantics = [#tpu.dimension_semantics<parallel>], iteration_bounds = array<i64: 4>, scalar_prefetch = 0 : i64, scratch_operands = 0 : i64, tpu.core_type = #tpu.core_type<tc>, window_params = [{transform_indices = @transform_0, window_bounds = array<i64: 64, 128>}, {pipeline_mode = #tpu.pipeline_mode<synchronous>, transform_indices = @transform_1, window_bounds = array<i64: 128, 128>}, {transform_indices = @transform_2, window_bounds = array<i64: 64, 128>}, {transform_indices = @transform_3, window_bounds = array<i64: 64, 128>}]} {
    %c0 = arith.constant 0 : index
    %c0_0 = arith.constant 0 : index
    %0 = vector.load %arg1[%c0, %c0_0] : memref<64x128xf32, #tpu.memory_space<vmem>>, vector<64x128xf32>
    %1 = arith.truncf %0 : vector<64x128xf32> to vector<64x128xbf16>
    %c0_1 = arith.constant 0 : index
    %c0_2 = arith.constant 0 : index
    %2 = vector.load %arg3[%c0_1, %c0_2] : memref<64x128xbf16, #tpu.memory_space<vmem>>, vector<64x128xbf16>
    tpu.vector_store %arg3[%c0_1, %c0_2], %1 {strides = array<i32>} : memref<64x128xbf16, #tpu.memory_space<vmem>>, vector<64x128xbf16>,
    %c0_3 = arith.constant 0 : index
    %c0_4 = arith.constant 0 : index
    %3 = vector.load %arg2[%c0_3, %c0_4] : memref<128x128xbf16, #tpu.memory_space<vmem>>, vector<128x128xbf16>
    %cst = arith.constant dense<0.000000e+00> : vector<64x128xf32>
    %4 = tpu.matmul %1, %3, %cst {dimension_numbers = #tpu.dot_dimension_numbers<[1], [0], [0], [1], [0, 0, 1, 1], [], []>} : vector<64x128xbf16>, vector<128x128xbf16>, vector<64x128xf32> -> vector<64x128xf32>
    %5 = arith.truncf %4 : vector<64x128xf32> to vector<64x128xbf16>
    %c0_5 = arith.constant 0 : index
    %c0_6 = arith.constant 0 : index
    %6 = vector.load %arg4[%c0_5, %c0_6] : memref<64x128xbf16, #tpu.memory_space<vmem>>, vector<64x128xbf16>
    tpu.vector_store %arg4[%c0_5, %c0_6], %5 {strides = array<i32>} : memref<64x128xbf16, #tpu.memory_space<vmem>>, vector<64x128xbf16>,
    return
  }
  func.func @transform_0(%arg0: i32) -> (i32, i32) {
    %c0_i32 = arith.constant 0 : i32
    %c0_i32_0 = arith.constant 0 : i32
    return %arg0, %c0_i32 : i32, i32
  }
  func.func @transform_1(%arg0: i32) -> (i32, i32) {
    %c0_i32 = arith.constant 0 : i32
    %c0_i32_0 = arith.constant 0 : i32
    %c0_i32_1 = arith.constant 0 : i32
    return %c0_i32, %c0_i32_0 : i32, i32
  }
  func.func @transform_2(%arg0: i32) -> (i32, i32) {
    %c0_i32 = arith.constant 0 : i32
    %c0_i32_0 = arith.constant 0 : i32
    return %arg0, %c0_i32 : i32, i32
  }
  func.func @transform_3(%arg0: i32) -> (i32, i32) {
    %c0_i32 = arith.constant 0 : i32
    %c0_i32_0 = arith.constant 0 : i32
    return %arg0, %c0_i32 : i32, i32
  }
}

</mosaic_0001>

<bundles_post_ra>
// kernel: tpu_custom_call.1
= control target key start
LH: loop header
LB: loop body
LE: loop exit
PB: predicated region body
PF: predicated region fallthrough
CT: control target
= control target key end

     0   :  { %9 = vsyncpa [#allocation3], 0  ;;  %s1099_s0 = inlined_call_operand.hbm [shape: f32[256,128], index: 0, kind: input, shape index: {}]   ;;  %s1100_s1 = inlined_call_operand.hbm [shape: bf16[128,128], index: 1, kind: input, shape index: {}]   ;;  %s1101_s2 = inlined_call_operand.hbm [shape: bf16[256,128], index: 2, kind: output, shape index: {0}]   ;;  %s1102_s3 = inlined_call_operand.hbm [shape: bf16[256,128], index: 3, kind: output, shape index: {1}]  }
   0x1   :  { %11 = vsyncpa [#allocation3 + $0x1], 0 }
   0x2   :  { %12 = vsyncpa [#allocation6], 0 }
   0x3   :  { %13 = vsyncpa [#allocation4], 0 }
   0x4   :  { %15 = vsyncpa [#allocation4 + $0x1], 0 }
   0x5   :  { %16 = vsyncpa [#allocation9], 0 }
   0x6   :  { %18 = vsyncpa [#allocation9 + $0x1], 0  ;;  %s925_s12 = smov 0   ;;  %s927_s13 = smov 0  }
   0x7   :  { %s929_s14 = smov 0   ;;  %s931_s15 = smov 0  }
   0x8 LB: > { %s946_s16 = sadd.s32 4294967295, %s896_s15   ;;  %s533_s17 = sadd.s32 4294967294, %s896_s15   ;;  %s896_s15 = sphi %s931_s15, %s1111_s15   ;;  %s892_s14 = sphi %s929_s14, %s1110_s14   ;;  %s888_s13 = sphi %s927_s13, %s1109_s13   ;;  %s884_s12 = sphi %s925_s12, %s1108_s12  }
   0x9   : > { %p44_p0 = scmp.ne.s32.totalorder %s888_s13, %s884_s12  ;;  %p45_p1 = scmp.eq.s32.totalorder %s946_s16, 0 }
   0xa   : > { %p89_p2 = scmp.eq.s32.totalorder %s946_s16, 3  ;;  %p95_p3 = scmp.eq.s32.totalorder %s533_s17, 3 }
   0xb   : > { %p955_p4 = por %p45_p1, %p44_p0  ;;  %p534_p5 = scmp.ge.s32.totalorder %s896_s15, 1 }
   0xc   : > { %p960_p6 = por %p95_p3, %p44_p0  ;;  %p128_p7 = scmp.lt.s32.totalorder %s896_s15, 5 }
   0xd   : > { %s139_s22 = sshll.u32 %s1100_s1, 4  ;;  %s898_s24 = smov [#allocation5]   ;;  %s140_s22 = int_to_ptr.hbm [resolvable:$true] %s139_s22 }
   0xe   : > { %p968_p8 = pnand %p534_p5, %p128_p7  ;;  %s141_s25 = sshll.u32 %s898_s24, 4  ;;  %s142_s25 = int_to_ptr.vmem [resolvable:$true] %s141_s25 }
   0xf   : > { %s977_s26 = sadd.s32 1, %s896_s15   ;;  %s899_s27 = smov 64  }
  0x10   : > { %p676_p9 = pneg %p968_p8  ;;  %s900_s28 = smov 4  }
  0x11   : > { %s28_s29 = ssub.s32 %s896_s15, %s977_s26  ;;  %s31_s30 = sadd.s32 1, %s892_s14 }
  0x12   : > { %p677_p10 = pnand %p676_p9, %p45_p1  ;;  %p29_p11 = scmp.eq.s32.totalorder %s28_s29, 0 }
  0x13   : > { %p38_p12 = scmp.ne.s32.totalorder %s892_s14, %s888_s13  ;;  %p39_p13 = scmp.eq.s32.totalorder %s896_s15, 0 }
  0x14   : > { %679 = dma.hbm_to_vmem [thread:$0]  (!%p677_p10), %s140_s22, 1024, %s142_s25, [#allocation6], %s899_s27, %s899_s27, %s900_s28  }
  0x15   : > { %p692_p0 = scmp.lt.s32.totalorder %s896_s15, 4  ;;  %p40_p3 = por %p39_p13, %p38_p12 }
  0x16   : > { %s987_s4 = scalar_select %p29_p11, %s892_s14, %s31_s30  }
  0x17   : > { %p991_p5 = por %p89_p2, %p38_p12  ;;  %s155_s6 = sand.u32 1, %s892_s14  }
  0x18   : > { %s585_s7 = sshll.u32 %s896_s15, 6  ;;  %s537_s8 = sshll.u32 %s155_s6, 6 }
  0x19   : > { %s164_s11 = scalar_lea.hbm %s1099_s0, %s585_s7  ;;  %s159_s20 = scalar_lea.vmem [#allocation2], %s537_s8 }
  0x1a   : > { %s165_s17 = sshll.u32 %s164_s11, 4  ;;  %s167_s21 = sshll.u32 %s159_s20, 4  ;;  %s166_s17 = int_to_ptr.hbm [resolvable:$true] %s165_s17  ;;  %s168_s21 = int_to_ptr.vmem [resolvable:$true] %s167_s21 }
  0x1b   : > { %p1002_p7 = pnand %p692_p0, %p40_p3  ;;  %s156_s24 = scalar_lea.sflag [#allocation3], %s155_s6 }
  0x1c   : > { %s764_s25 = sshra.s32 %s166_s17, 4  ;;  %s771_s30 = scalar_lea.hbm %s1099_s0, 256  ;;  %s765_s25 = int_to_ptr.hbm [resolvable:$true] %s764_s25 }
  0x1d   : > { %s766_s27 = scalar_lea.hbm %s765_s25, 64  ;;  %p768_p9 = pneg %p1002_p7 }
  0x1e   : > { %p767_p2 = scmp.ne.s32.totalorder %s765_s25, %s766_s27  ;;  %p772_p12 = scmp.lt.s32.totalorder %s765_s25, %s1099_s0 }
  0x1f   : > { %p773_p13 = scmp.lt.s32.totalorder %s771_s30, %s766_s27 }
  0x20   : > { %p769_p10 = pnand %p768_p9, %p767_p2 }
  0x21   : > { %p774_p0 = por %p773_p13, %p772_p12 }
  0x22   : > { %p770_p11 = pneg %p769_p10 }
  0x24   : > { %p775_p3 = pnand %p774_p0, %p770_p11 }
  0x26   : > { %778 = shalt.err (!%p775_p3)
}
  0x27   : > { %s901_s6 = smov 128   ;;  %s902_s9 = smov 8  }
  0x28   : > { %683 = dma.hbm_to_vmem [thread:$0]  (!%p1002_p7), %s166_s17, 1024, %s168_s21, %s156_s24, %s901_s6, %s901_s6, %s902_s9  }
  0x29   : > { %179 = sbr.rel (%p968_p8) target bundleno = 228 (0xe4), region = 28  ;;  %s1019_s10 = sand.u32 (!%p968_p8), 1, %s888_s13  }
  0x2a   : > { %s541_s11 = sshll.u32 (!%p968_p8), %s1019_s10, 6  ;;  %s182_s20 = scalar_lea.sflag (!%p968_p8), [#allocation3], %s1019_s10 }
  0x2b   : > { %s185_s25 = scalar_lea.vmem (!%p968_p8), [#allocation2], %s541_s11 }
  0x2e   : > { %867 = dma.done.wait (%p955_p4), %s182_s20, 1024  }
  0x2f   : > { %869 = vsyncadd (%p955_p4), %s182_s20, 4294966272 }
  0x30   : > { %871 = dma.done.wait (%p45_p1), [#allocation6], 1024  }
  0x31   : > { %873 = vsyncadd (%p45_p1), [#allocation6], 4294966272  ;;  %v593_v0 = vld [vmem:[#allocation5 + $0x38] sm:$0xff]  ;;  %v592_v1 = vld [vmem:[#allocation5 + $0x30] sm:$0xff]  ;;  %s543_s23 = sshll.u32 %s1019_s10, 5  ;;  %s594_s21 = sshll.u32 %s946_s16, 5 }
  0x32   : > { %334 = vmatpush.bf16.msra.mxu0 %v593_v0  ;;  %642 = vmatpush.bf16.msra.mxu1 %v593_v0  ;;  %v222_v2 = vld [vmem:[%s185_s25] sm:$0xff]  ;;  %v223_v3 = vld [vmem:[%s185_s25 + $0x8] sm:$0xff]  ;;  %v224_v5 = vld [vmem:[%s185_s25 + $0x10] sm:$0xff]  ;;  %s1034_s18 = scalar_lea.vmem [#allocation7], %s543_s23  ;;  %s396_s27 = scalar_lea.hbm %s1101_s2, %s594_s21 }
  0x33   : > { %643 = vmatpush.bf16.msra.mxu2 %v593_v0  ;;  %644 = vmatpush.bf16.msra.mxu3 %v593_v0  ;;  %v599_v4 = vpack.c.bf16 %v223_v3, %v222_v2  ;;  %v225_v6 = vld [vmem:[%s185_s25 + $0x18] sm:$0xff]  ;;  %v226_v8 = vld [vmem:[%s185_s25 + $0x20] sm:$0xff]  ;;  %v227_v9 = vld [vmem:[%s185_s25 + $0x28] sm:$0xff]  ;;  %v230_v18 = vpack.c.bf16 %v222_v2, %v222_v2  ;;  %v231_v19 = vpack.c.bf16 %v223_v3, %v223_v3  ;;  %s397_s17 = sshll.u32 %s1034_s18, 4  ;;  %s399_s28 = sshll.u32 %s396_s27, 4  ;;  %s398_s17 = int_to_ptr.vmem [resolvable:$true] %s397_s17  ;;  %s400_s28 = int_to_ptr.hbm [resolvable:$true] %s399_s28 }
  0x34   : > { %v604_v7 = vpack.c.bf16 %v225_v6, %v224_v5  ;;  %v591_v10 = vld [vmem:[#allocation5 + $0x28] sm:$0xff]  ;;  %v609_v11 = vpack.c.bf16 %v227_v9, %v226_v8  ;;  %v228_v12 = vld [vmem:[%s185_s25 + $0x30] sm:$0xff]  ;;  %v229_v13 = vld [vmem:[%s185_s25 + $0x38] sm:$0xff]  ;;  %v232_v20 = vpack.c.bf16 %v224_v5, %v224_v5  ;;  %v233_v21 = vpack.c.bf16 %v225_v6, %v225_v6  ;;  %s380_s29 = scalar_lea.sflag [#allocation4], %s1019_s10  ;;  %s808_s30 = sshra.s32 %s400_s28, 4  ;;  %s809_s30 = int_to_ptr.hbm [resolvable:$true] %s808_s30 }
  0x35   : > { %600 = vst [vmem:[%s1034_s18] sm:$0xff] %v599_v4   ;;  %v614_v14 = vpack.c.bf16 %v229_v13, %v228_v12  ;;  %v590_v15 = vld [vmem:[#allocation5 + $0x20] sm:$0xff]  ;;  %v589_v16 = vld [vmem:[#allocation5 + $0x18] sm:$0xff]  ;;  %v588_v17 = vld [vmem:[#allocation5 + $0x10] sm:$0xff]  ;;  %v234_v22 = vpack.c.bf16 %v226_v8, %v226_v8  ;;  %v235_v24 = vpack.c.bf16 %v227_v9, %v227_v9  ;;  %v236_v25 = vpack.c.bf16 %v228_v12, %v228_v12  ;;  %s810_s7 = scalar_lea.hbm %s809_s30, 32  ;;  %s814_s9 = scalar_lea.hbm %s1101_s2, 128 }
  0x36   : > { %335 = vmatpush.bf16.msra.mxu0 %v592_v1  ;;  %645 = vmatpush.bf16.msra.mxu1 %v592_v1  ;;  %636 = vst [vmem:[%s1034_s18 + $0x8] sm:$0xff] %v604_v7   ;;  %v587_v23 = vld [vmem:[#allocation5 + $0x8] sm:$0xff]  ;;  %v237_v26 = vpack.c.bf16 %v229_v13, %v229_v13  ;;  %v270_v27 = vunpack.c.l.b16 %v230_v18  ;;  %v271_v28 = vunpack.c.l.b16 %v231_v19  ;;  %v272_v29 = vunpack.c.l.b16 %v232_v20  ;;  %v586_v31 = vld [vmem:[#allocation5] sm:$0xff]  ;;  %p811_p1 = scmp.ne.s32.totalorder %s809_s30, %s810_s7  ;;  %p815_p7 = scmp.lt.s32.totalorder %s809_s30, %s1101_s2 }
  0x37   : > { %646 = vmatpush.bf16.msra.mxu2 %v592_v1  ;;  %647 = vmatpush.bf16.msra.mxu3 %v592_v1  ;;  %637 = vst [vmem:[%s1034_s18 + $0x10] sm:$0xff] %v609_v11   ;;  %v273_v30 = vunpack.c.l.b16 %v233_v21  ;;  %v274_v32 = vunpack.c.l.b16 %v234_v22  ;;  %v275_v33 = vunpack.c.l.b16 %v235_v24  ;;  %v276_v34 = vunpack.c.l.b16 %v236_v25  ;;  %p816_p2 = scmp.lt.s32.totalorder %s814_s9, %s810_s7 }
  0x38   : > { %638 = vst [vmem:[%s1034_s18 + $0x18] sm:$0xff] %v614_v14   ;;  %v277_v35 = vunpack.c.l.b16 %v237_v26  ;;  %v278_v36 = vpack.c.b16 %v271_v28, %v270_v27  ;;  %p812_p4 = pnand %p811_p1, %p991_p5 }
  0x39   : > { %v279_v37 = vpack.c.b16 %v273_v30, %v272_v29  ;;  %v280_v38 = vpack.c.b16 %v275_v33, %v274_v32  ;;  %p817_p9 = por %p816_p2, %p815_p7 }
  0x3a   : > { %336 = vmatpush.bf16.msra.mxu0 %v591_v10  ;;  %648 = vmatpush.bf16.msra.mxu1 %v591_v10  ;;  %v281_v39 = vpack.c.b16 %v277_v35, %v276_v34  ;;  %p813_p8 = pneg %p812_p4 }
  0x3b   : > { %649 = vmatpush.bf16.msra.mxu2 %v591_v10  ;;  %650 = vmatpush.bf16.msra.mxu3 %v591_v10 }
  0x3c   : > { %p818_p10 = pnand %p817_p9, %p813_p8 }
  0x3e   : > { %337 = vmatpush.bf16.msra.mxu0 %v590_v15  ;;  %651 = vmatpush.bf16.msra.mxu1 %v590_v15 }
  0x3f   : > { %652 = vmatpush.bf16.msra.mxu2 %v590_v15  ;;  %653 = vmatpush.bf16.msra.mxu3 %v590_v15 }
  0x42   : > { %338 = vmatpush.bf16.msra.mxu0 %v589_v16  ;;  %654 = vmatpush.bf16.msra.mxu1 %v589_v16 }
  0x43   : > { %655 = vmatpush.bf16.msra.mxu2 %v589_v16  ;;  %656 = vmatpush.bf16.msra.mxu3 %v589_v16 }
  0x46   : > { %339 = vmatpush.bf16.msra.mxu0 %v588_v17  ;;  %657 = vmatpush.bf16.msra.mxu1 %v588_v17 }
  0x47   : > { %658 = vmatpush.bf16.msra.mxu2 %v588_v17  ;;  %659 = vmatpush.bf16.msra.mxu3 %v588_v17 }
  0x4a   : > { %340 = vmatpush.bf16.msra.mxu0 %v587_v23  ;;  %660 = vmatpush.bf16.msra.mxu1 %v587_v23 }
  0x4b   : > { %661 = vmatpush.bf16.msra.mxu2 %v587_v23  ;;  %662 = vmatpush.bf16.msra.mxu3 %v587_v23 }
  0x4e   : > { %341 = vmatpush.bf16.msra.mxu0 %v586_v31  ;;  %663 = vmatpush.bf16.msra.mxu1 %v586_v31 }
  0x4f   : > { %664 = vmatpush.bf16.msra.mxu2 %v586_v31  ;;  %665 = vmatpush.bf16.msra.mxu3 %v586_v31 }
  0x51   : > { %342 = vmatmul.bf16.vlgmr.msra.gmra.mxu0 %v278_v36  ;;  %347 = vmatmul.bf16.vlgmr.msra.gmra.mxu1 %v279_v37 }
  0x52   : > { %352 = vmatmul.bf16.vlgmr.msra.gmra.mxu2 %v280_v38  ;;  %357 = vmatmul.bf16.vlgmr.msra.gmra.mxu3 %v281_v39 }
  0x53   : > { %821 = shalt.err (!%p818_p10)
}
  0x54   : > { %s903_s25 = smov 64   ;;  %s904_s18 = smov 4  }
  0x55   : > { %672 = dma.vmem_to_hbm [thread:$0]  (%p991_p5), %s398_s17, 512, %s400_s28, %s380_s29, %s903_s25, %s903_s25, %s904_s18  }
  0x56   : > { %s218_s22 = scalar_lea.vmem [#allocation8], %s543_s23  ;;  %s413_s30 = scalar_lea.hbm %s1102_s3, %s594_s21 }
  0x57   : > { %s414_s17 = sshll.u32 %s218_s22, 4  ;;  %s416_s28 = sshll.u32 %s413_s30, 4  ;;  %s415_s17 = int_to_ptr.vmem [resolvable:$true] %s414_s17  ;;  %s417_s28 = int_to_ptr.hbm [resolvable:$true] %s416_s28 }
  0x58   : > { %s385_s29 = scalar_lea.sflag [#allocation9], %s1019_s10  ;;  %s836_s23 = sshra.s32 %s417_s28, 4  ;;  %s837_s23 = int_to_ptr.hbm [resolvable:$true] %s836_s23 }
  0x59   : > { %s838_s16 = scalar_lea.hbm %s837_s23, 32  ;;  %s842_s8 = scalar_lea.hbm %s1102_s3, 128 }
  0x5a   : > { %p839_p11 = scmp.ne.s32.totalorder %s837_s23, %s838_s16  ;;  %p843_p0 = scmp.lt.s32.totalorder %s837_s23, %s1102_s3 }
  0x5b   : > { %p844_p3 = scmp.lt.s32.totalorder %s842_s8, %s838_s16 }
  0x5c   : > { %p840_p12 = pnand %p839_p11, %p991_p5 }
  0x5d   : > { %p845_p1 = por %p844_p3, %p843_p0 }
  0x5e   : > { %p841_p13 = pneg %p840_p12 }
  0x60   : > { %p846_p4 = pnand %p845_p1, %p841_p13 }
  0xce   : > { %v343_v40 = vpop.f32.mrf.mxu0  ;;  %v348_v41 = vpop.f32.mrf.mxu1 }
  0xd5   : > { %v353_v42 = vpop.f32.mrf.mxu2  ;;  %v358_v43 = vpop.f32.mrf.mxu3 }
  0xd6   : > { %v345_v44 = vpop.f32.mrf.mxu0  ;;  %v350_v45 = vpop.f32.mrf.mxu1 }
  0xd7   : > { %v619_v46 = vpack.c.bf16 %v345_v44, %v343_v40  ;;  %v624_v47 = vpack.c.bf16 %v350_v45, %v348_v41 }
  0xd9   : > { %620 = vst [vmem:[%s218_s22] sm:$0xff] %v619_v46  }
  0xda   : > { %639 = vst [vmem:[%s218_s22 + $0x8] sm:$0xff] %v624_v47  }
  0xdd   : > { %v355_v48 = vpop.f32.mrf.mxu2  ;;  %v360_v49 = vpop.f32.mrf.mxu3 }
  0xde   : > { %v629_v50 = vpack.c.bf16 %v355_v48, %v353_v42  ;;  %v634_v51 = vpack.c.bf16 %v360_v49, %v358_v43 }
  0xe0   : > { %640 = vst [vmem:[%s218_s22 + $0x10] sm:$0xff] %v629_v50  }
  0xe1   : > { %641 = vst [vmem:[%s218_s22 + $0x18] sm:$0xff] %v634_v51  }
  0xe2   : > { %849 = shalt.err (!%p846_p4)
}
  0xe3   : > { %673 = dma.vmem_to_hbm [thread:$0]  (%p991_p5), %s415_s17, 512, %s417_s28, %s385_s29, %s903_s25, %s903_s25, %s904_s18  }
  0xe4 PF: > { %p694_p8 = scmp.ge.s32.totalorder %s896_s15, 2  ;;  %s431_s10 = sand.u32 1, %s884_s12  }
  0xe5   : > { %s432_s11 = scalar_lea.sflag [#allocation4], %s431_s10 }
  0xe6   : > { %p685_p7 = pnand %p694_p8, %p960_p6 }
  0xe8   : > { %p686_p2 = pneg %p685_p7 }
  0xea   : > { %875 = dma.done.wait (%p686_p2), %s432_s11, 512  }
  0xeb   : > { %877 = vsyncadd (%p686_p2), %s432_s11, 4294966784  ;;  %s442_s20 = scalar_lea.sflag [#allocation9], %s431_s10 }
  0xec   : > { %879 = dma.done.wait (%p686_p2), %s442_s20, 512  }
  0xed   : > { %881 = vsyncadd (%p686_p2), %s442_s20, 4294966784  ;;  %p21_p5 = scmp.ge.s32.totalorder %s977_s26, 6   ;;  %s1108_s12 = smov %s888_s13 }
  0xee   : > { %s1109_s13 = smov %s892_s14  ;;  %s1110_s14 = smov %s987_s4 }
  0xef   : > { %s1111_s15 = smov %s977_s26  ;;  %23 = sbr.rel (!%p21_p5) target bundleno = 8 (0x8), region = 94 }
  0xf4   :  { %448 = vsyncpa [#allocation3], 1 }
  0xf5   :  { %450 = vsyncpa [#allocation3 + $0x1], 1 }
  0xf6   :  { %451 = vsyncpa [#allocation6], 1 }
  0xf7   :  { %452 = vsyncpa [#allocation4], 1 }
  0xf8   :  { %454 = vsyncpa [#allocation4 + $0x1], 1 }
  0xf9   :  { %455 = vsyncpa [#allocation9], 1 }
  0xfa   :  { %457 = vsyncpa [#allocation9 + $0x1], 1 }

</bundles_post_ra>
